<compile_context>
chip_gen: v5e
topology: v5e:2x2
jax: 0.10.0
libtpu: 0.0.40
codegen_flags: <defaults>
</compile_context>

<pallas_src>
import functools

import jax
import jax.numpy as jnp
from jax.experimental import pallas as pl
from jax.experimental.pallas import tpu as pltpu


def _round_up(x, m):
    return ((x + m - 1) // m) * m


def mlp_kernel(x_ref, w1_ref, b1_ref, w2_ref, b2_ref, o_ref, acc_ref):
    # Grid = (batch tiles, hidden tiles).  Hidden axis is a reduction:
    #   out = sum_k relu(x @ W1[:, k] + b1[k]) @ W2[k, :]   (+ b2 at the end)
    # which is exact because ReLU/bias are elementwise per hidden column.
    k = pl.program_id(1)

    @pl.when(k == 0)
    def _init():
        acc_ref[...] = jnp.zeros_like(acc_ref)

    h = jnp.dot(x_ref[...], w1_ref[...], preferred_element_type=jnp.float32)
    h = jnp.maximum(h + b1_ref[...], 0.0)                    # f32 bias + ReLU (VPU)
    acc_ref[...] += jnp.dot(h.astype(w2_ref.dtype), w2_ref[...],
                            preferred_element_type=jnp.float32)

    @pl.when(k == pl.num_programs(1) - 1)
    def _finalize():
        o_ref[...] = (acc_ref[...] + b2_ref[...]).astype(o_ref.dtype)


def pad_params(w1, b1, w2, b2):
    """Pad weights/biases to lane multiples ONCE (outside the per-call path).

    Zero padding is exact: padded feature columns hit zero W1 rows, padded
    hidden columns are relu(0)=0 against zero W2 rows, padded output columns
    are sliced off by net_forward.
    """
    F, H = w1.shape
    O = w2.shape[1]
    Fp, Hp, Op = _round_up(F, 128), _round_up(H, 128), _round_up(O, 128)

    # bf16 matmul inputs (with f32 accumulate) once sizes are MXU-relevant.
    wdt = jnp.bfloat16 if max(F, H, O) > 256 else jnp.float32

    w1p = jnp.zeros((Fp, Hp), wdt).at[:F, :H].set(w1.astype(wdt))
    b1p = jnp.zeros((1, Hp), jnp.float32).at[:, :H].set(
        b1.reshape(1, H).astype(jnp.float32))
    w2p = jnp.zeros((Hp, Op), wdt).at[:H, :O].set(w2.astype(wdt))
    b2p = jnp.zeros((1, Op), jnp.float32).at[:, :O].set(
        b2.reshape(1, O).astype(jnp.float32))
    return w1p, b1p, w2p, b2p


@functools.partial(jax.jit, static_argnames=("n_output", "tile_b", "tile_h"))
def net_forward(x, w1p, b1p, w2p, b2p, *, n_output, tile_b=None, tile_h=None):
    B, F = x.shape
    Fp, Hp = w1p.shape
    Op = w2p.shape[1]
    in_dt = w1p.dtype
    itemsize = jnp.dtype(in_dt).itemsize

    # --- batch tiling (trace-time Python on static shapes) -------------------
    if tile_b is None:
        if B <= 256:
            tile_b = _round_up(B, 8)                 # single grid step
        else:
            # >=2 tiles (v7x 2-TC sharding), capped at 512 rows per tile.
            tile_b = min(512, _round_up(-(-B // 2), 8))
    Bp = _round_up(B, tile_b)

    # --- hidden tiling: biggest 128-multiple divisor of Hp, capped at 2048 ---
    if tile_h is None:
        tile_h = min(Hp, 2048)
        while Hp % tile_h != 0:
            tile_h -= 128
    assert Hp % tile_h == 0 and tile_h % 128 == 0
    grid = (Bp // tile_b, Hp // tile_h)
    grid_h = grid[1]

    # Pad only the activation per call (fused under jit; weights pre-padded).
    xp = jnp.zeros((Bp, Fp), in_dt).at[:B, :F].set(x.astype(in_dt))

    # Single-buffer big resident weights (constant index_map) to save VMEM.
    w_bytes = (Fp * Hp + Hp * Op) * itemsize
    single_buffer_weights = (grid_h == 1) and (w_bytes > (8 << 20))
    if single_buffer_weights:
        w1_spec = pl.BlockSpec((Fp, tile_h), lambda i, k: (0, k),
                               pipeline_mode=pl.Buffered(1))
        w2_spec = pl.BlockSpec((tile_h, Op), lambda i, k: (k, 0),
                               pipeline_mode=pl.Buffered(1))
    else:
        w1_spec = pl.BlockSpec((Fp, tile_h), lambda i, k: (0, k))
        w2_spec = pl.BlockSpec((tile_h, Op), lambda i, k: (k, 0))

    # Explicit VMEM budget (matters on v7x 64 MiB / v5e 16 MiB scoped default).
    vmem_est = (
        2 * tile_b * Fp * itemsize                                   # x tiles
        + 2 * tile_b * Op * 4                                        # out tiles
        + (1 if single_buffer_weights else 2)
        * (Fp * tile_h + tile_h * Op) * itemsize                     # weights
        + 2 * (tile_h + Op) * 4                                      # biases
        + tile_b * Op * 4                                            # acc scratch
    )
    vmem_limit = min(128 << 20, max(32 << 20, int(vmem_est * 1.5)))

    out = pl.pallas_call(
        mlp_kernel,
        out_shape=jax.ShapeDtypeStruct((Bp, Op), jnp.float32),
        grid=grid,
        in_specs=[
            pl.BlockSpec((tile_b, Fp), lambda i, k: (i, 0)),   # x batch tile
            w1_spec,                                           # W1 hidden tile
            pl.BlockSpec((1, tile_h), lambda i, k: (0, k)),    # b1 hidden tile
            w2_spec,                                           # W2 hidden tile
            pl.BlockSpec((1, Op), lambda i, k: (0, 0)),        # b2 resident
        ],
        out_specs=pl.BlockSpec((tile_b, Op), lambda i, k: (i, 0)),
        scratch_shapes=[pltpu.VMEM((tile_b, Op), jnp.float32)],
        compiler_params=pltpu.CompilerParams(
            # batch axis independent (v7x megacore), hidden axis is a reduction
            dimension_semantics=("parallel", "arbitrary"),
            vmem_limit_bytes=vmem_limit,
        ),
    )(xp, w1p, b1p, w2p, b2p)
    # Slice fuses under jit; no extra HBM round-trip.
    return out[:B, :n_output]


def init_params(key, n_feature, n_hidden, n_output):
    # Deterministic init mimicking torch.nn.Linear (uniform(-1/sqrt(fan_in), +)).
    k1, k2, k3, k4 = jax.random.split(key, 4)
    lim1 = 1.0 / jnp.sqrt(n_feature)
    lim2 = 1.0 / jnp.sqrt(n_hidden)
    w1 = jax.random.uniform(k1, (n_feature, n_hidden), jnp.float32, -lim1, lim1)
    b1 = jax.random.uniform(k2, (1, n_hidden), jnp.float32, -lim1, lim1)
    w2 = jax.random.uniform(k3, (n_hidden, n_output), jnp.float32, -lim2, lim2)
    b2 = jax.random.uniform(k4, (1, n_output), jnp.float32, -lim2, lim2)
    return w1, b1, w2, b2


if __name__ == "__main__":
    # --- main case: toy Net sizes, single-step fast path ----------------------
    n_feature, n_hidden, n_output = 32, 64, 16
    batch = 16

    key = jax.random.PRNGKey(0)
    kx, kp = jax.random.split(key)
    x = jax.random.normal(kx, (batch, n_feature), jnp.float32)
    w1, b1, w2, b2 = init_params(kp, n_feature, n_hidden, n_output)

    w1p, b1p, w2p, b2p = pad_params(w1, b1, w2, b2)          # padded once
    out = net_forward(x, w1p, b1p, w2p, b2p, n_output=n_output)
    out = jax.block_until_ready(out)

    ref = jnp.maximum(x @ w1 + b1, 0.0) @ w2 + b2
    assert out.shape == (batch, n_output)
    assert jnp.allclose(out, ref, atol=1e-5, rtol=1e-5)

    # --- secondary check: force multi-tile batch + hidden-reduction path ------
    nf2, nh2, no2 = 32, 160, 16                              # Hp=256 -> 2 hidden tiles
    x2 = jax.random.normal(jax.random.PRNGKey(1), (24, nf2), jnp.float32)
    p2 = init_params(jax.random.PRNGKey(2), nf2, nh2, no2)
    pp2 = pad_params(*p2)
    out2 = net_forward(x2, *pp2, n_output=no2, tile_b=8, tile_h=128)
    out2 = jax.block_until_ready(out2)
    ref2 = jnp.maximum(x2 @ p2[0] + p2[1], 0.0) @ p2[2] + p2[3]
    assert out2.shape == (24, no2)
    assert jnp.allclose(out2, ref2, atol=1e-4, rtol=1e-4)

    print("KERNEL_OK")
</pallas_src>

<mosaic_0001>
module attributes {stable_mosaic.version = 11 : i64} {
  func.func @mlp_kernel(%arg0: i32, %arg1: i32, %arg2: memref<16x128xf32, #tpu.memory_space<vmem>>, %arg3: memref<128x128xf32, #tpu.memory_space<vmem>>, %arg4: memref<1x128xf32, #tpu.memory_space<vmem>>, %arg5: memref<128x128xf32, #tpu.memory_space<vmem>>, %arg6: memref<1x128xf32, #tpu.memory_space<vmem>>, %arg7: memref<16x128xf32, #tpu.memory_space<vmem>>, %arg8: memref<16x128xf32, #tpu.memory_space<vmem>>) attributes {dimension_semantics = [#tpu.dimension_semantics<parallel>, #tpu.dimension_semantics<arbitrary>], iteration_bounds = array<i64: 1, 1>, scalar_prefetch = 0 : i64, scratch_operands = 1 : i64, tpu.core_type = #tpu.core_type<tc>, window_params = [{transform_indices = @transform_0, window_bounds = array<i64: 16, 128>}, {transform_indices = @transform_1, window_bounds = array<i64: 128, 128>}, {transform_indices = @transform_2, window_bounds = array<i64: 1, 128>}, {transform_indices = @transform_3, window_bounds = array<i64: 128, 128>}, {pipeline_mode = #tpu.pipeline_mode<synchronous>, transform_indices = @transform_4, window_bounds = array<i64: 1, 128>}, {transform_indices = @transform_5, window_bounds = array<i64: 16, 128>}]} {
    %c0_i32 = arith.constant 0 : i32
    %0 = arith.cmpi eq, %arg1, %c0_i32 : i32
    %1 = arith.extui %0 : i1 to i32
    %c0_i32_0 = arith.constant 0 : i32
    %2 = arith.cmpi ne, %1, %c0_i32_0 : i32
    scf.if %2 {
      %cst_16 = arith.constant 0.000000e+00 : f32
      %19 = vector.broadcast %cst_16 : f32 to vector<16x128xf32>
      %c0_17 = arith.constant 0 : index
      %c0_18 = arith.constant 0 : index
      %20 = vector.load %arg8[%c0_17, %c0_18] : memref<16x128xf32, #tpu.memory_space<vmem>>, vector<16x128xf32>
      tpu.vector_store %arg8[%c0_17, %c0_18], %19 {strides = array<i32>} : memref<16x128xf32, #tpu.memory_space<vmem>>, vector<16x128xf32>,
    } else {
    }
    %c0 = arith.constant 0 : index
    %c0_1 = arith.constant 0 : index
    %3 = vector.load %arg2[%c0, %c0_1] : memref<16x128xf32, #tpu.memory_space<vmem>>, vector<16x128xf32>
    %c0_2 = arith.constant 0 : index
    %c0_3 = arith.constant 0 : index
    %4 = vector.load %arg3[%c0_2, %c0_3] : memref<128x128xf32, #tpu.memory_space<vmem>>, vector<128x128xf32>
    %cst = arith.constant dense<0.000000e+00> : vector<16x128xf32>
    %5 = tpu.matmul %3, %4, %cst {dimension_numbers = #tpu.dot_dimension_numbers<[1], [0], [0], [1], [0, 0, 1, 1], [], []>} : vector<16x128xf32>, vector<128x128xf32>, vector<16x128xf32> -> vector<16x128xf32>
    %c0_4 = arith.constant 0 : index
    %c0_5 = arith.constant 0 : index
    %6 = vector.load %arg4[%c0_4, %c0_5] : memref<1x128xf32, #tpu.memory_space<vmem>>, vector<1x128xf32>
    %7 = vector.broadcast %6 : vector<1x128xf32> to vector<16x128xf32>
    %8 = arith.addf %5, %7 : vector<16x128xf32>
    %cst_6 = arith.constant 0.000000e+00 : f32
    %9 = vector.broadcast %cst_6 : f32 to vector<16x128xf32>
    %10 = arith.maximumf %8, %9 : vector<16x128xf32>
    %c0_7 = arith.constant 0 : index
    %c0_8 = arith.constant 0 : index
    %11 = vector.load %arg8[%c0_7, %c0_8] : memref<16x128xf32, #tpu.memory_space<vmem>>, vector<16x128xf32>
    %c0_9 = arith.constant 0 : index
    %c0_10 = arith.constant 0 : index
    %12 = vector.load %arg5[%c0_9, %c0_10] : memref<128x128xf32, #tpu.memory_space<vmem>>, vector<128x128xf32>
    %cst_11 = arith.constant dense<0.000000e+00> : vector<16x128xf32>
    %13 = tpu.matmul %10, %12, %cst_11 {dimension_numbers = #tpu.dot_dimension_numbers<[1], [0], [0], [1], [0, 0, 1, 1], [], []>} : vector<16x128xf32>, vector<128x128xf32>, vector<16x128xf32> -> vector<16x128xf32>
    %14 = arith.addf %11, %13 : vector<16x128xf32>
    %c0_12 = arith.constant 0 : index
    %c0_13 = arith.constant 0 : index
    %15 = vector.load %arg8[%c0_12, %c0_13] : memref<16x128xf32, #tpu.memory_space<vmem>>, vector<16x128xf32>
    tpu.vector_store %arg8[%c0_12, %c0_13], %14 {strides = array<i32>} : memref<16x128xf32, #tpu.memory_space<vmem>>, vector<16x128xf32>,
    %c0_i32_14 = arith.constant 0 : i32
    %16 = arith.cmpi eq, %arg1, %c0_i32_14 : i32
    %17 = arith.extui %16 : i1 to i32
    %c0_i32_15 = arith.constant 0 : i32
    %18 = arith.cmpi ne, %17, %c0_i32_15 : i32
    scf.if %18 {
      %c0_16 = arith.constant 0 : index
      %c0_17 = arith.constant 0 : index
      %19 = vector.load %arg8[%c0_16, %c0_17] : memref<16x128xf32, #tpu.memory_space<vmem>>, vector<16x128xf32>
      %c0_18 = arith.constant 0 : index
      %c0_19 = arith.constant 0 : index
      %20 = vector.load %arg6[%c0_18, %c0_19] : memref<1x128xf32, #tpu.memory_space<vmem>>, vector<1x128xf32>
      %21 = vector.broadcast %20 : vector<1x128xf32> to vector<16x128xf32>
      %22 = arith.addf %19, %21 : vector<16x128xf32>
      %c0_20 = arith.constant 0 : index
      %c0_21 = arith.constant 0 : index
      %23 = vector.load %arg7[%c0_20, %c0_21] : memref<16x128xf32, #tpu.memory_space<vmem>>, vector<16x128xf32>
      tpu.vector_store %arg7[%c0_20, %c0_21], %22 {strides = array<i32>} : memref<16x128xf32, #tpu.memory_space<vmem>>, vector<16x128xf32>,
    } else {
    }
    return
  }
  func.func @transform_0(%arg0: i32, %arg1: i32) -> (i32, i32) {
    %c0_i32 = arith.constant 0 : i32
    %c0_i32_0 = arith.constant 0 : i32
    return %arg0, %c0_i32 : i32, i32
  }
  func.func @transform_1(%arg0: i32, %arg1: i32) -> (i32, i32) {
    %c0_i32 = arith.constant 0 : i32
    %c0_i32_0 = arith.constant 0 : i32
    return %c0_i32, %arg1 : i32, i32
  }
  func.func @transform_2(%arg0: i32, %arg1: i32) -> (i32, i32) {
    %c0_i32 = arith.constant 0 : i32
    %c0_i32_0 = arith.constant 0 : i32
    return %c0_i32, %arg1 : i32, i32
  }
  func.func @transform_3(%arg0: i32, %arg1: i32) -> (i32, i32) {
    %c0_i32 = arith.constant 0 : i32
    %c0_i32_0 = arith.constant 0 : i32
    return %arg1, %c0_i32 : i32, i32
  }
  func.func @transform_4(%arg0: i32, %arg1: i32) -> (i32, i32) {
    %c0_i32 = arith.constant 0 : i32
    %c0_i32_0 = arith.constant 0 : i32
    %c0_i32_1 = arith.constant 0 : i32
    return %c0_i32, %c0_i32_0 : i32, i32
  }
  func.func @transform_5(%arg0: i32, %arg1: i32) -> (i32, i32) {
    %c0_i32 = arith.constant 0 : i32
    %c0_i32_0 = arith.constant 0 : i32
    return %arg0, %c0_i32 : i32, i32
  }
}

</mosaic_0001>

<bundles_post_ra>
// kernel: net_forward.1
= control target key start
LH: loop header
LB: loop body
LE: loop exit
PB: predicated region body
PF: predicated region fallthrough
CT: control target
= control target key end

     0   :  { %10 = vsyncpa [#allocation4], 0  ;;  %s366_s0 = inlined_call_operand.vmem [shape: f32[16,128], index: 0, kind: input, shape index: {}]   ;;  %s367_s1 = inlined_call_operand.hbm [shape: f32[128,128], index: 1, kind: input, shape index: {}]   ;;  %s368_s2 = inlined_call_operand.vmem [shape: f32[1,128], index: 2, kind: input, shape index: {}]   ;;  %s369_s3 = inlined_call_operand.hbm [shape: f32[128,128], index: 3, kind: input, shape index: {}]   ;;  %s370_s4 = inlined_call_operand.vmem [shape: f32[1,128], index: 4, kind: input, shape index: {}]   ;;  %s371_s5 = inlined_call_operand.hbm [shape: f32[16,128], index: 5, kind: output, shape index: {}]  }
   0x1   :  { %11 = vsyncpa [#allocation7], 0 }
   0x2   :  { %12 = vsyncpa [#allocation5], 0  ;;  %s19_s20 = sshll.u32 %s367_s1, 4  ;;  %s301_s21 = smov [#allocation3]   ;;  %s20_s20 = int_to_ptr.hbm [resolvable:$true] %s19_s20 }
   0x3   :  { %s21_s22 = sshll.u32 %s301_s21, 4  ;;  %s34_s25 = sshll.u32 %s369_s3, 4  ;;  %s22_s22 = int_to_ptr.vmem [resolvable:$true] %s21_s22  ;;  %s35_s25 = int_to_ptr.hbm [resolvable:$true] %s34_s25 }
   0x4   :  { %s302_s26 = smov 128   ;;  %s303_s27 = smov 8  }
   0x5   :  { %27 = dma.hbm_to_vmem [thread:$0]  %s20_s20, 2048, %s22_s22, [#allocation4], %s302_s26, %s302_s26, %s303_s27  }
   0x6   :  { %s304_s28 = smov [#allocation6]  }
   0x7   :  { %s36_s29 = sshll.u32 %s304_s28, 4  ;;  %s37_s29 = int_to_ptr.vmem [resolvable:$true] %s36_s29 }
   0x8   :  { %42 = dma.hbm_to_vmem [thread:$0]  %s35_s25, 2048, %s37_s29, [#allocation7], %s302_s26, %s302_s26, %s303_s27  }
   0x9   :  { %295 = dma.done.wait [#allocation4], 2048  }
   0xa   :  { %296 = vsyncadd [#allocation4], 4294965248 }
   0xb   :  { %297 = dma.done.wait [#allocation7], 2048  }
   0xc   :  { %298 = vsyncadd [#allocation7], 4294965248  ;;  %v76_v0 = vld [vmem:[#allocation3 + $0x78] sm:$0xff]  ;;  %v75_v1 = vld [vmem:[#allocation3 + $0x70] sm:$0xff]  ;;  %s305_s10 = smov [#allocation8]  }
   0xd   :  { %184 = vmatpush.msra.mxu2 %v76_v0  ;;  %81 = vmatpush.msra.mxu0 %v76_v0  ;;  %v74_v2 = vld [vmem:[#allocation3 + $0x68] sm:$0xff]  ;;  %v73_v3 = vld [vmem:[#allocation3 + $0x60] sm:$0xff]  ;;  %v72_v4 = vld [vmem:[#allocation3 + $0x58] sm:$0xff]  ;;  %s168_s11 = sshll.u32 %s305_s10, 4  ;;  %s169_s11 = int_to_ptr.vmem [resolvable:$true] %s168_s11 }
   0xe   :  { %v123_v5 = vld [vmem:[#allocation6 + $0x78] sm:$0xff]  ;;  %v122_v6 = vld [vmem:[#allocation6 + $0x70] sm:$0xff]  ;;  %v121_v8 = vld [vmem:[#allocation6 + $0x68] sm:$0xff] }
   0xf   :  { %185 = vmatpush.msra.mxu2 %v75_v1  ;;  %82 = vmatpush.msra.mxu0 %v75_v1  ;;  %v71_v7 = vld [vmem:[#allocation3 + $0x50] sm:$0xff]  ;;  %v70_v9 = vld [vmem:[#allocation3 + $0x48] sm:$0xff]  ;;  %v120_v10 = vld [vmem:[#allocation6 + $0x60] sm:$0xff] }
  0x10   :  { %200 = vmatpush.msra.mxu3 %v123_v5  ;;  %124 = vmatpush.msra.mxu1 %v123_v5  ;;  %v69_v11 = vld [vmem:[#allocation3 + $0x40] sm:$0xff]  ;;  %v119_v12 = vld [vmem:[#allocation6 + $0x58] sm:$0xff]  ;;  %v118_v14 = vld [vmem:[#allocation6 + $0x50] sm:$0xff] }
  0x11   :  { %186 = vmatpush.msra.mxu2 %v74_v2  ;;  %83 = vmatpush.msra.mxu0 %v74_v2  ;;  %v68_v13 = vld [vmem:[#allocation3 + $0x38] sm:$0xff]  ;;  %v67_v15 = vld [vmem:[#allocation3 + $0x30] sm:$0xff]  ;;  %v117_v16 = vld [vmem:[#allocation6 + $0x48] sm:$0xff] }
  0x12   :  { %201 = vmatpush.msra.mxu3 %v122_v6  ;;  %125 = vmatpush.msra.mxu1 %v122_v6  ;;  %v66_v17 = vld [vmem:[#allocation3 + $0x28] sm:$0xff]  ;;  %v116_v18 = vld [vmem:[#allocation6 + $0x40] sm:$0xff]  ;;  %v115_v20 = vld [vmem:[#allocation6 + $0x38] sm:$0xff] }
  0x13   :  { %187 = vmatpush.msra.mxu2 %v73_v3  ;;  %84 = vmatpush.msra.mxu0 %v73_v3  ;;  %v65_v19 = vld [vmem:[#allocation3 + $0x20] sm:$0xff]  ;;  %v64_v21 = vld [vmem:[#allocation3 + $0x18] sm:$0xff]  ;;  %v114_v22 = vld [vmem:[#allocation6 + $0x30] sm:$0xff] }
  0x14   :  { %202 = vmatpush.msra.mxu3 %v121_v8  ;;  %126 = vmatpush.msra.mxu1 %v121_v8  ;;  %v63_v23 = vld [vmem:[#allocation3 + $0x10] sm:$0xff]  ;;  %v113_v24 = vld [vmem:[#allocation6 + $0x28] sm:$0xff]  ;;  %v112_v26 = vld [vmem:[#allocation6 + $0x20] sm:$0xff] }
  0x15   :  { %188 = vmatpush.msra.mxu2 %v72_v4  ;;  %85 = vmatpush.msra.mxu0 %v72_v4  ;;  %v62_v25 = vld [vmem:[#allocation3 + $0x8] sm:$0xff]  ;;  %v61_v27 = vld [vmem:[#allocation3] sm:$0xff]  ;;  %v111_v30 = vld [vmem:[#allocation6 + $0x18] sm:$0xff] }
  0x16   :  { %203 = vmatpush.msra.mxu3 %v120_v10  ;;  %127 = vmatpush.msra.mxu1 %v120_v10  ;;  %v60_v28 = vld [vmem:[%s366_s0 + $0x8] sm:$0xff]  ;;  %v59_v29 = vld [vmem:[%s366_s0] sm:$0xff]  ;;  %v110_v31 = vld [vmem:[#allocation6 + $0x10] sm:$0xff] }
  0x17   :  { %189 = vmatpush.msra.mxu2 %v71_v7  ;;  %86 = vmatpush.msra.mxu0 %v71_v7  ;;  %v109_v32 = vld [vmem:[#allocation6 + $0x8] sm:$0xff]  ;;  %v108_v33 = vld [vmem:[#allocation6] sm:$0xff] }
  0x18   :  { %204 = vmatpush.msra.mxu3 %v119_v12  ;;  %128 = vmatpush.msra.mxu1 %v119_v12  ;;  %v221_v34 = vld [vmem:[%s368_s2] ss:$0 sm:$0xff]  ;;  %s170_s2 = sshll.u32 %s371_s5, 4  ;;  %s171_s2 = int_to_ptr.hbm [resolvable:$true] %s170_s2 }
  0x19   :  { %190 = vmatpush.msra.mxu2 %v70_v9  ;;  %87 = vmatpush.msra.mxu0 %v70_v9  ;;  %v222_v41 = vld [vmem:[%s370_s4] ss:$0 sm:$0xff] }
  0x1a   :  { %205 = vmatpush.msra.mxu3 %v118_v14  ;;  %129 = vmatpush.msra.mxu1 %v118_v14 }
  0x1b   :  { %191 = vmatpush.msra.mxu2 %v69_v11  ;;  %88 = vmatpush.msra.mxu0 %v69_v11 }
  0x1c   :  { %206 = vmatpush.msra.mxu3 %v117_v16  ;;  %130 = vmatpush.msra.mxu1 %v117_v16 }
  0x1d   :  { %192 = vmatpush.msra.mxu2 %v68_v13  ;;  %89 = vmatpush.msra.mxu0 %v68_v13 }
  0x1e   :  { %207 = vmatpush.msra.mxu3 %v116_v18  ;;  %131 = vmatpush.msra.mxu1 %v116_v18 }
  0x1f   :  { %193 = vmatpush.msra.mxu2 %v67_v15  ;;  %90 = vmatpush.msra.mxu0 %v67_v15 }
  0x20   :  { %208 = vmatpush.msra.mxu3 %v115_v20  ;;  %132 = vmatpush.msra.mxu1 %v115_v20 }
  0x21   :  { %194 = vmatpush.msra.mxu2 %v66_v17  ;;  %91 = vmatpush.msra.mxu0 %v66_v17 }
  0x22   :  { %209 = vmatpush.msra.mxu3 %v114_v22  ;;  %133 = vmatpush.msra.mxu1 %v114_v22 }
  0x23   :  { %195 = vmatpush.msra.mxu2 %v65_v19  ;;  %92 = vmatpush.msra.mxu0 %v65_v19 }
  0x24   :  { %210 = vmatpush.msra.mxu3 %v113_v24  ;;  %134 = vmatpush.msra.mxu1 %v113_v24 }
  0x25   :  { %196 = vmatpush.msra.mxu2 %v64_v21  ;;  %93 = vmatpush.msra.mxu0 %v64_v21 }
  0x26   :  { %211 = vmatpush.msra.mxu3 %v112_v26  ;;  %135 = vmatpush.msra.mxu1 %v112_v26 }
  0x27   :  { %197 = vmatpush.msra.mxu2 %v63_v23  ;;  %94 = vmatpush.msra.mxu0 %v63_v23 }
  0x28   :  { %212 = vmatpush.msra.mxu3 %v111_v30  ;;  %136 = vmatpush.msra.mxu1 %v111_v30 }
  0x29   :  { %198 = vmatpush.msra.mxu2 %v62_v25  ;;  %95 = vmatpush.msra.mxu0 %v62_v25 }
  0x2a   :  { %213 = vmatpush.msra.mxu3 %v110_v31  ;;  %137 = vmatpush.msra.mxu1 %v110_v31 }
  0x2b   :  { %199 = vmatpush.msra.mxu2 %v61_v27  ;;  %96 = vmatpush.msra.mxu0 %v61_v27 }
  0x2c   :  { %100 = vmatmul.f32.vlgmr.msra.gmra.mxu2 %v60_v28  ;;  %97 = vmatmul.f32.vlgmr.msra.gmra.mxu0 %v59_v29 }
  0x2d   :  { %214 = vmatpush.msra.mxu3 %v109_v32  ;;  %138 = vmatpush.msra.mxu1 %v109_v32 }
  0x2f   :  { %215 = vmatpush.msra.mxu3 %v108_v33  ;;  %139 = vmatpush.msra.mxu1 %v108_v33 }
  0xa9   :  { %v98_v35 = vpop.f32.mrf.mxu0 }
  0xaa   :  { %v99_v36 = vadd.f32 %v221_v34, %v98_v35 }
  0xac   :  { %v104_v37 = vmax.f32 %v99_v36, 0.0 }
  0xae   :  { %140 = vmatmul.f32.vlgmr.msra.gmra.mxu1 %v104_v37 }
  0xaf   :  { %v101_v38 = vpop.f32.mrf.mxu2 }
  0xb0   :  { %v102_v39 = vadd.f32 %v221_v34, %v101_v38 }
  0xb2   :  { %v105_v40 = vmax.f32 %v102_v39, 0.0 }
  0xb4   :  { %143 = vmatmul.f32.vlgmr.msra.gmra.mxu3 %v105_v40 }
 0x12b   :  { %v141_v42 = vpop.f32.mrf.mxu1 }
 0x12c   :  { %v160_v43 = vadd.f32 %v222_v41, %v141_v42 }
 0x12e   :  { %162 = vst [vmem:[#allocation8] sm:$0xff] %v160_v43 }
 0x137   :  { %v144_v44 = vpop.f32.mrf.mxu3 }
 0x138   :  { %v161_v45 = vadd.f32 %v222_v41, %v144_v44 }
 0x13a   :  { %163 = vst [vmem:[#allocation8 + $0x8] sm:$0xff] %v161_v45 }
 0x13b   :  { %176 = dma.vmem_to_hbm [thread:$0]  %s169_s11, 256, %s171_s2, [#allocation5], %s302_s26, %s302_s26, %s303_s27  }
 0x13c   :  { %299 = dma.done.wait [#allocation5], 256  }
 0x13d   :  { %300 = vsyncadd [#allocation5], 4294967040 }
 0x13e   :  { %181 = vsyncpa [#allocation4], 1 }
 0x13f   :  { %182 = vsyncpa [#allocation7], 1 }
 0x140   :  { %183 = vsyncpa [#allocation5], 1 }

</bundles_post_ra>
